<compile_context>
chip_gen: v7x
topology: tpu7x:2x2x1
jax: 0.10.0
libtpu: 0.0.40
codegen_flags: <defaults>
</compile_context>

<pallas_src>
import jax
import jax.numpy as jnp
from jax.experimental import pallas as pl
from jax.experimental.pallas import tpu as pltpu


# ---------------------------------------------------------------------------
# Kernel: fused FiLM conditioning over a tile of edges
# ---------------------------------------------------------------------------
def _film_kernel(src_ref, dst_ref, bidx_ref, ea_ref,
                 wsrc_ref, wdst_ref, utab_ref, o_ref):
    edge_dim = ea_ref.shape[-1]
    te = src_ref.shape[0]
    b_pad = utab_ref.shape[0]

    # pre = [src|dst|u[batch]] @ [W_gamma|W_beta] + [b_gamma|b_beta]
    # without ever building the concatenated cond matrix.
    pre = jnp.dot(src_ref[...], wsrc_ref[...],
                  preferred_element_type=jnp.float32)
    pre = pre + jnp.dot(dst_ref[...], wdst_ref[...],
                        preferred_element_type=jnp.float32)

    # u[batch] @ W_u + b  via one-hot(batch) @ (u @ W_u + b)  (table resident
    # in VMEM, tiny K on the MXU; no [E, u_dim] gather in HBM).
    ids = bidx_ref[...]                                          # [te, 1] i32
    iota = jax.lax.broadcasted_iota(jnp.int32, (te, b_pad), 1)
    onehot = (iota == ids).astype(jnp.float32)                   # [te, b_pad]
    pre = pre + jnp.dot(onehot, utab_ref[...],
                        preferred_element_type=jnp.float32)      # [te, 2*ed]

    gamma = jax.nn.sigmoid(pre[:, :edge_dim])                    # [te, ed]
    beta = pre[:, edge_dim:]                                     # [te, ed]

    ea = ea_ref[...].astype(jnp.float32)
    o_ref[...] = (gamma * ea + beta).astype(o_ref.dtype)


# ---------------------------------------------------------------------------
# Wrapper
# ---------------------------------------------------------------------------
def edge_film_forward(src, dst, edge_attr, u, batch, params, *,
                      tile_edges=2048, use_bf16=True):
    E, node_dim = src.shape
    edge_dim = edge_attr.shape[-1]
    B, _ = u.shape

    # Fuse gamma/beta Linears along the output axis; split along the cond axis.
    w_gb = jnp.concatenate([params["gamma_w"], params["beta_w"]], axis=1)
    b_gb = jnp.concatenate([params["gamma_b"], params["beta_b"]], axis=-1)
    w_src = w_gb[:node_dim]
    w_dst = w_gb[node_dim:2 * node_dim]
    w_u = w_gb[2 * node_dim:]

    # Per-graph u contribution (bias folded in); stays fully resident in VMEM.
    u_tab = (u.astype(jnp.float32) @ w_u.astype(jnp.float32)
             + b_gb.astype(jnp.float32)[None, :])                # [B, 2*ed]
    b_pad = ((B + 7) // 8) * 8
    if b_pad != B:
        u_tab = jnp.pad(u_tab, ((0, b_pad - B), (0, 0)))

    mm_dtype = jnp.bfloat16 if use_bf16 else jnp.float32
    src_m = src.astype(mm_dtype)
    dst_m = dst.astype(mm_dtype)
    w_src_m = w_src.astype(mm_dtype)
    w_dst_m = w_dst.astype(mm_dtype)
    bidx = batch.astype(jnp.int32).reshape(E, 1)

    # Ragged edge tiling: no jnp.pad of the edge streams; last tile is masked.
    te = min(tile_edges, ((E + 7) // 8) * 8)
    grid = (pl.cdiv(E, te),)

    itemsize = 2 if use_bf16 else 4
    bytes_accessed = int(
        E * (2 * node_dim * itemsize + 4 + 2 * edge_dim * 4)
        + 2 * node_dim * 2 * edge_dim * itemsize + u_tab.size * 4)
    flops = int(2 * E * (2 * node_dim + b_pad) * (2 * edge_dim)
                + 3 * E * edge_dim)
    cost = pl.CostEstimate(flops=flops,
                           transcendentals=int(E * edge_dim),
                           bytes_accessed=bytes_accessed)

    return pl.pallas_call(
        _film_kernel,
        out_shape=jax.ShapeDtypeStruct((E, edge_dim), jnp.float32),
        grid=grid,
        in_specs=[
            pl.BlockSpec((te, node_dim), lambda i: (i, 0)),          # src
            pl.BlockSpec((te, node_dim), lambda i: (i, 0)),          # dst
            pl.BlockSpec((te, 1), lambda i: (i, 0)),                 # batch ids
            pl.BlockSpec((te, edge_dim), lambda i: (i, 0)),          # edge_attr
            pl.BlockSpec((node_dim, 2 * edge_dim), lambda i: (0, 0)),  # W_src
            pl.BlockSpec((node_dim, 2 * edge_dim), lambda i: (0, 0)),  # W_dst
            pl.BlockSpec((b_pad, 2 * edge_dim), lambda i: (0, 0)),     # u table
        ],
        out_specs=pl.BlockSpec((te, edge_dim), lambda i: (i, 0)),
        compiler_params=pltpu.CompilerParams(
            dimension_semantics=("parallel",),
            vmem_limit_bytes=48 * 1024 * 1024),
        cost_estimate=cost,
    )(src_m, dst_m, bidx, edge_attr, w_src_m, w_dst_m, u_tab)


# ---------------------------------------------------------------------------
# Pure-JAX reference (mirrors the PyTorch forward)
# ---------------------------------------------------------------------------
def reference_forward(src, dst, edge_attr, u, batch, params):
    cond = jnp.concatenate([src, dst, u[batch]], axis=1)
    gamma = jax.nn.sigmoid(cond @ params["gamma_w"] + params["gamma_b"])
    beta = cond @ params["beta_w"] + params["beta_b"]
    return gamma * edge_attr + beta


# ---------------------------------------------------------------------------
# Deterministic parameter init (shapes match EdgeFiLMModel with num_layers=1)
# ---------------------------------------------------------------------------
def init_params(key, cond_dim, edge_dim):
    ks = jax.random.split(key, 4)
    s = 0.1
    f32 = jnp.float32
    return {
        "gamma_w": s * jax.random.normal(ks[0], (cond_dim, edge_dim), f32),
        "gamma_b": s * jax.random.normal(ks[1], (edge_dim,), f32),
        "beta_w":  s * jax.random.normal(ks[2], (cond_dim, edge_dim), f32),
        "beta_b":  s * jax.random.normal(ks[3], (edge_dim,), f32),
    }


def _make_inputs(key, counts, node_dim, u_dim, edge_dim):
    B = len(counts)
    E = sum(counts)
    k1, k2, k3, k4 = jax.random.split(key, 4)
    src = jax.random.normal(k1, (E, node_dim), jnp.float32)
    dst = jax.random.normal(k2, (E, node_dim), jnp.float32)
    edge_attr = jax.random.normal(k3, (E, edge_dim), jnp.float32)
    u = jax.random.normal(k4, (B, u_dim), jnp.float32)
    batch = jnp.concatenate(
        [jnp.full((c,), i, jnp.int32) for i, c in enumerate(counts)])
    return src, dst, edge_attr, u, batch


if __name__ == "__main__":
    key = jax.random.PRNGKey(0)
    node_dim = 16
    u_dim = 16
    edge_dim = 32
    cond_dim = 2 * node_dim + u_dim

    kin, kp, kin2 = jax.random.split(key, 3)
    params = init_params(kp, cond_dim, edge_dim)

    # --- small case (E=12, ragged single tile) ---
    src, dst, edge_attr, u, batch = _make_inputs(
        kin, [7, 5], node_dim, u_dim, edge_dim)
    E = src.shape[0]
    ref = reference_forward(src, dst, edge_attr, u, batch, params)

    out_f32 = jax.block_until_ready(
        edge_film_forward(src, dst, edge_attr, u, batch, params,
                          use_bf16=False))
    assert out_f32.shape == (E, edge_dim)
    assert jnp.allclose(out_f32, ref, atol=2e-3, rtol=2e-3), float(
        jnp.max(jnp.abs(out_f32 - ref)))

    out_bf16 = jax.block_until_ready(
        edge_film_forward(src, dst, edge_attr, u, batch, params))  # bf16 default
    assert jnp.allclose(out_bf16, ref, atol=7e-2, rtol=7e-2), float(
        jnp.max(jnp.abs(out_bf16 - ref)))

    # --- multi-tile ragged case (E=300, 3 graphs, tile_edges=128 -> grid=3) ---
    src2, dst2, edge_attr2, u2, batch2 = _make_inputs(
        kin2, [120, 100, 80], node_dim, u_dim, edge_dim)
    ref2 = reference_forward(src2, dst2, edge_attr2, u2, batch2, params)
    out2 = jax.block_until_ready(
        edge_film_forward(src2, dst2, edge_attr2, u2, batch2, params,
                          tile_edges=128, use_bf16=False))
    assert out2.shape == ref2.shape
    assert jnp.allclose(out2, ref2, atol=2e-3, rtol=2e-3), float(
        jnp.max(jnp.abs(out2 - ref2)))

    print("KERNEL_OK")
</pallas_src>

<mosaic_0001>
module attributes {stable_mosaic.version = 11 : i64} {
  func.func @_film_kernel(%arg0: i32, %arg1: memref<16x16xf32, #tpu.memory_space<vmem>>, %arg2: memref<16x16xf32, #tpu.memory_space<vmem>>, %arg3: memref<16x1xi32, #tpu.memory_space<vmem>>, %arg4: memref<16x32xf32, #tpu.memory_space<vmem>>, %arg5: memref<16x64xf32, #tpu.memory_space<vmem>>, %arg6: memref<16x64xf32, #tpu.memory_space<vmem>>, %arg7: memref<8x64xf32, #tpu.memory_space<vmem>>, %arg8: memref<16x32xf32, #tpu.memory_space<vmem>>) attributes {dimension_semantics = [#tpu.dimension_semantics<parallel>], iteration_bounds = array<i64: 1>, scalar_prefetch = 0 : i64, scratch_operands = 0 : i64, tpu.core_type = #tpu.core_type<tc>, window_params = [{transform_indices = @transform_0, window_bounds = array<i64: 16, 16>}, {transform_indices = @transform_1, window_bounds = array<i64: 16, 16>}, {transform_indices = @transform_2, window_bounds = array<i64: 16, 1>}, {transform_indices = @transform_3, window_bounds = array<i64: 16, 32>}, {pipeline_mode = #tpu.pipeline_mode<synchronous>, transform_indices = @transform_4, window_bounds = array<i64: 16, 64>}, {pipeline_mode = #tpu.pipeline_mode<synchronous>, transform_indices = @transform_5, window_bounds = array<i64: 16, 64>}, {pipeline_mode = #tpu.pipeline_mode<synchronous>, transform_indices = @transform_6, window_bounds = array<i64: 8, 64>}, {transform_indices = @transform_7, window_bounds = array<i64: 16, 32>}]} {
    %c0 = arith.constant 0 : index
    %c0_0 = arith.constant 0 : index
    %0 = vector.load %arg1[%c0, %c0_0] : memref<16x16xf32, #tpu.memory_space<vmem>>, vector<16x16xf32>
    %c0_1 = arith.constant 0 : index
    %c0_2 = arith.constant 0 : index
    %1 = vector.load %arg5[%c0_1, %c0_2] : memref<16x64xf32, #tpu.memory_space<vmem>>, vector<16x64xf32>
    %cst = arith.constant dense<0.000000e+00> : vector<16x64xf32>
    %2 = tpu.matmul %0, %1, %cst {dimension_numbers = #tpu.dot_dimension_numbers<[1], [0], [0], [1], [0, 0, 1, 1], [], []>} : vector<16x16xf32>, vector<16x64xf32>, vector<16x64xf32> -> vector<16x64xf32>
    %c0_3 = arith.constant 0 : index
    %c0_4 = arith.constant 0 : index
    %3 = vector.load %arg2[%c0_3, %c0_4] : memref<16x16xf32, #tpu.memory_space<vmem>>, vector<16x16xf32>
    %c0_5 = arith.constant 0 : index
    %c0_6 = arith.constant 0 : index
    %4 = vector.load %arg6[%c0_5, %c0_6] : memref<16x64xf32, #tpu.memory_space<vmem>>, vector<16x64xf32>
    %cst_7 = arith.constant dense<0.000000e+00> : vector<16x64xf32>
    %5 = tpu.matmul %3, %4, %cst_7 {dimension_numbers = #tpu.dot_dimension_numbers<[1], [0], [0], [1], [0, 0, 1, 1], [], []>} : vector<16x16xf32>, vector<16x64xf32>, vector<16x64xf32> -> vector<16x64xf32>
    %6 = arith.addf %2, %5 : vector<16x64xf32>
    %c0_8 = arith.constant 0 : index
    %c0_9 = arith.constant 0 : index
    %7 = vector.load %arg3[%c0_8, %c0_9] : memref<16x1xi32, #tpu.memory_space<vmem>>, vector<16x1xi32>
    %8 = tpu.iota {dimensions = array<i32: 1>} : vector<16x8xi32>
    %9 = vector.broadcast %7 : vector<16x1xi32> to vector<16x8xi32>
    %10 = arith.cmpi eq, %8, %9 : vector<16x8xi32>
    %11 = arith.extui %10 : vector<16x8xi1> to vector<16x8xi32>
    %12 = arith.sitofp %11 : vector<16x8xi32> to vector<16x8xf32>
    %c0_10 = arith.constant 0 : index
    %c0_11 = arith.constant 0 : index
    %13 = vector.load %arg7[%c0_10, %c0_11] : memref<8x64xf32, #tpu.memory_space<vmem>>, vector<8x64xf32>
    %cst_12 = arith.constant dense<0.000000e+00> : vector<16x64xf32>
    %14 = tpu.matmul %12, %13, %cst_12 {dimension_numbers = #tpu.dot_dimension_numbers<[1], [0], [0], [1], [0, 0, 1, 1], [], []>} : vector<16x8xf32>, vector<8x64xf32>, vector<16x64xf32> -> vector<16x64xf32>
    %15 = arith.addf %6, %14 : vector<16x64xf32>
    %16 = vector.extract_strided_slice %15 {offsets = [0, 0], sizes = [16, 32], strides = [1, 1]} : vector<16x64xf32> to vector<16x32xf32>
    %17 = arith.negf %16 : vector<16x32xf32>
    %18 = math.exp %17 : vector<16x32xf32>
    %cst_13 = arith.constant 1.000000e+00 : f32
    %19 = vector.broadcast %cst_13 : f32 to vector<16x32xf32>
    %20 = arith.addf %19, %18 : vector<16x32xf32>
    %21 = arith.divf %19, %20 : vector<16x32xf32>
    %22 = vector.extract_strided_slice %15 {offsets = [0, 32], sizes = [16, 32], strides = [1, 1]} : vector<16x64xf32> to vector<16x32xf32>
    %c0_14 = arith.constant 0 : index
    %c0_15 = arith.constant 0 : index
    %23 = vector.load %arg4[%c0_14, %c0_15] : memref<16x32xf32, #tpu.memory_space<vmem>>, vector<16x32xf32>
    %24 = arith.mulf %21, %23 : vector<16x32xf32>
    %25 = arith.addf %24, %22 : vector<16x32xf32>
    %c0_16 = arith.constant 0 : index
    %c0_17 = arith.constant 0 : index
    %26 = vector.load %arg8[%c0_16, %c0_17] : memref<16x32xf32, #tpu.memory_space<vmem>>, vector<16x32xf32>
    tpu.vector_store %arg8[%c0_16, %c0_17], %25 {strides = array<i32>} : memref<16x32xf32, #tpu.memory_space<vmem>>, vector<16x32xf32>,
    return
  }
  func.func @transform_0(%arg0: i32) -> (i32, i32) {
    %c0_i32 = arith.constant 0 : i32
    %c0_i32_0 = arith.constant 0 : i32
    return %arg0, %c0_i32 : i32, i32
  }
  func.func @transform_1(%arg0: i32) -> (i32, i32) {
    %c0_i32 = arith.constant 0 : i32
    %c0_i32_0 = arith.constant 0 : i32
    return %arg0, %c0_i32 : i32, i32
  }
  func.func @transform_2(%arg0: i32) -> (i32, i32) {
    %c0_i32 = arith.constant 0 : i32
    %c0_i32_0 = arith.constant 0 : i32
    return %arg0, %c0_i32 : i32, i32
  }
  func.func @transform_3(%arg0: i32) -> (i32, i32) {
    %c0_i32 = arith.constant 0 : i32
    %c0_i32_0 = arith.constant 0 : i32
    return %arg0, %c0_i32 : i32, i32
  }
  func.func @transform_4(%arg0: i32) -> (i32, i32) {
    %c0_i32 = arith.constant 0 : i32
    %c0_i32_0 = arith.constant 0 : i32
    %c0_i32_1 = arith.constant 0 : i32
    return %c0_i32, %c0_i32_0 : i32, i32
  }
  func.func @transform_5(%arg0: i32) -> (i32, i32) {
    %c0_i32 = arith.constant 0 : i32
    %c0_i32_0 = arith.constant 0 : i32
    %c0_i32_1 = arith.constant 0 : i32
    return %c0_i32, %c0_i32_0 : i32, i32
  }
  func.func @transform_6(%arg0: i32) -> (i32, i32) {
    %c0_i32 = arith.constant 0 : i32
    %c0_i32_0 = arith.constant 0 : i32
    %c0_i32_1 = arith.constant 0 : i32
    return %c0_i32, %c0_i32_0 : i32, i32
  }
  func.func @transform_7(%arg0: i32) -> (i32, i32) {
    %c0_i32 = arith.constant 0 : i32
    %c0_i32_0 = arith.constant 0 : i32
    return %arg0, %c0_i32 : i32, i32
  }
}

</mosaic_0001>

<bundles_post_ra>
// kernel: tpu_custom_call.1
= control target key start
LH: loop header
LB: loop body
LE: loop exit
PB: predicated region body
PF: predicated region fallthrough
CT: control target
= control target key end

     0   :  { %12 = vsyncpa [#allocation3], 0  ;;  %s740_s0 = inlined_call_operand.vmem [shape: f32[12,16], index: 0, kind: input, shape index: {}]   ;;  %s741_s1 = inlined_call_operand.hbm [shape: f32[12,16], index: 1, kind: input, shape index: {}]   ;;  %s742_s2 = inlined_call_operand.vmem [shape: s32[12,1], index: 2, kind: input, shape index: {}]   ;;  %s743_s3 = inlined_call_operand.hbm [shape: f32[12,32], index: 3, kind: input, shape index: {}]   ;;  %s744_s4 = inlined_call_operand.vmem [shape: f32[16,64], index: 4, kind: input, shape index: {}]   ;;  %s745_s5 = inlined_call_operand.hbm [shape: f32[16,64], index: 5, kind: input, shape index: {}]   ;;  %s746_s6 = inlined_call_operand.hbm [shape: f32[8,64], index: 6, kind: input, shape index: {}]   ;;  %s747_s7 = inlined_call_operand.hbm [shape: f32[12,32], index: 7, kind: output, shape index: {}]  }
   0x1   :  { %13 = vsyncpa [#allocation6], 0 }
   0x2   :  { %14 = vsyncpa [#allocation9], 0 }
   0x3   :  { %15 = vsyncpa [#allocation4], 0  ;;  %s589_s24 = smov [#allocation5]   ;;  %s590_s26 = smov [#allocation2]  }
   0x4   :  { %s37_s25 = sshll.u32 %s589_s24, 4  ;;  %s23_s27 = sshll.u32 %s590_s26, 4  ;;  %s38_s25 = int_to_ptr.vmem [resolvable:$true] %s37_s25  ;;  %s639_s27 = int_to_ptr.vmem [resolvable:$true] %s23_s27 }
   0x5   :  { %s471_s30 = scalar_lea.hbm %s743_s3, 256 }
   0x6   :  { %p472_p0 = scmp.ne.s32.totalorder %s743_s3, %s471_s30  ;;  %p475_p1 = scmp.lt.u32.totalorder %s471_s30, %s743_s3 }
   0x8   :  { %p477_p2 = pnand %p475_p1, %p472_p0 }
   0xa   :  { %480 = shalt.err (!%p477_p2)
}
   0xb   :  { %s481_s12 = scalar_lea.vmem %s38_s25, 256  ;;  %p486_p4 = scmp.lt.s32.totalorder %s38_s25, %s38_s25 }
   0xc   :  { %p482_p3 = scmp.ne.s32.totalorder %s38_s25, %s481_s12  ;;  %p487_p5 = scmp.lt.s32.totalorder %s481_s12, %s481_s12 }
   0xe   :  { %p488_p6 = por %p487_p5, %p486_p4 }
  0x10   :  { %p489_p7 = pnand %p488_p6, %p482_p3 }
  0x12   :  { %492 = shalt.err (!%p489_p7)
}
  0x13   :  { %s591_s13 = smov 128   ;;  %s592_s14 = smov 8  }
  0x14   :  { %43 = dma.hbm_to_vmem [thread:$0]  %s743_s3, 256, %s38_s25, [#allocation6], %s591_s13, %s591_s13, %s592_s14  }
  0x15   :  { %s493_s19 = scalar_lea.hbm %s741_s1, 256 }
  0x16   :  { %p494_p8 = scmp.ne.s32.totalorder %s741_s1, %s493_s19  ;;  %p497_p9 = scmp.lt.u32.totalorder %s493_s19, %s741_s1 }
  0x18   :  { %p499_p10 = pnand %p497_p9, %p494_p8 }
  0x1a   :  { %502 = shalt.err (!%p499_p10)
}
  0x1b   :  { %s503_s24 = scalar_lea.vmem %s639_s27, 256  ;;  %p508_p12 = scmp.lt.s32.totalorder %s639_s27, %s639_s27 }
  0x1c   :  { %p504_p11 = scmp.ne.s32.totalorder %s639_s27, %s503_s24  ;;  %p509_p13 = scmp.lt.s32.totalorder %s503_s24, %s503_s24 }
  0x1e   :  { %p510_p0 = por %p509_p13, %p508_p12 }
  0x20   :  { %p511_p1 = pnand %p510_p0, %p504_p11 }
  0x22   :  { %514 = shalt.err (!%p511_p1)
}
  0x23   :  { %29 = dma.hbm_to_vmem [thread:$0]  %s741_s1, 256, %s639_s27, [#allocation3], %s591_s13, %s591_s13, %s592_s14  }
  0x24   :  { %s593_s26 = smov [#allocation7]   ;;  %s594_s29 = smov [#allocation8]  }
  0x25   :  { %s51_s28 = sshll.u32 %s593_s26, 4  ;;  %s64_s30 = sshll.u32 %s594_s29, 4  ;;  %s52_s28 = int_to_ptr.vmem [resolvable:$true] %s51_s28  ;;  %s65_s30 = int_to_ptr.vmem [resolvable:$true] %s64_s30 }
  0x26   :  { %s515_s10 = scalar_lea.hbm %s745_s5, 256 }
  0x27   :  { %p516_p2 = scmp.ne.s32.totalorder %s745_s5, %s515_s10  ;;  %p519_p3 = scmp.lt.u32.totalorder %s515_s10, %s745_s5 }
  0x29   :  { %p521_p4 = pnand %p519_p3, %p516_p2 }
  0x2b   :  { %524 = shalt.err (!%p521_p4)
}
  0x2c   :  { %s525_s1 = scalar_lea.vmem %s52_s28, 256  ;;  %p530_p6 = scmp.lt.s32.totalorder %s52_s28, %s52_s28 }
  0x2d   :  { %p526_p5 = scmp.ne.s32.totalorder %s52_s28, %s525_s1  ;;  %p531_p7 = scmp.lt.s32.totalorder %s525_s1, %s525_s1 }
  0x2f   :  { %p532_p8 = por %p531_p7, %p530_p6 }
  0x31   :  { %p533_p9 = pnand %p532_p8, %p526_p5 }
  0x33   :  { %536 = shalt.err (!%p533_p9)
}
  0x34   :  { %57 = dma.hbm_to_vmem [thread:$0]  %s745_s5, 256, %s52_s28, [#allocation6], %s591_s13, %s591_s13, %s592_s14  }
  0x35   :  { %s537_s20 = scalar_lea.hbm %s746_s6, 128 }
  0x36   :  { %p538_p10 = scmp.ne.s32.totalorder %s746_s6, %s537_s20  ;;  %p541_p11 = scmp.lt.u32.totalorder %s537_s20, %s746_s6 }
  0x38   :  { %p543_p12 = pnand %p541_p11, %p538_p10 }
  0x3a   :  { %546 = shalt.err (!%p543_p12)
}
  0x3b   :  { %s547_s3 = scalar_lea.vmem %s65_s30, 128  ;;  %p552_p0 = scmp.lt.s32.totalorder %s65_s30, %s65_s30 }
  0x3c   :  { %p548_p13 = scmp.ne.s32.totalorder %s65_s30, %s547_s3  ;;  %p553_p1 = scmp.lt.s32.totalorder %s547_s3, %s547_s3 }
  0x3e   :  { %p554_p2 = por %p553_p1, %p552_p0 }
  0x40   :  { %p555_p3 = pnand %p554_p2, %p548_p13 }
  0x42   :  { %558 = shalt.err (!%p555_p3)
}
  0x43   :  { %67 = dma.hbm_to_vmem [thread:$0]  %s746_s6, 128, %s65_s30, [#allocation9]  }
  0x44   :  { %581 = dma.done.wait [#allocation3], 256  }
  0x45   :  { %582 = vsyncadd [#allocation3], 4294967040 }
  0x46   :  { %583 = dma.done.wait [#allocation6], 512  }
  0x47   :  { %584 = vsyncadd [#allocation6], 4294966784 }
  0x48   :  { %585 = dma.done.wait [#allocation9], 128  }
  0x49   :  { %586 = vsyncadd [#allocation9], 4294967168  ;;  %v595_v0 = vmov 0   ;;  %vm88_vm0 = vcmask 130048   ;;  %v251_v1 = vld [vmem:[%s742_s2] sm:$0xff]  ;;  %v83_v3 = vld [vmem:[%s744_s4 + $0x8] sm:$0xff]  ;;  %v253_v14 = vlaneseq }
  0x4a   :  { %462 = vset.pattern.permute.xlu0 %v595_v0  ;;  %v82_v2 = vld [vmem:[%s744_s4] sm:$0xff]  ;;  %v252_v5 = vld [vmem:[%s742_s2 + $0x8] sm:$0xff]  ;;  %v267_v9 = vld [vmem:[#allocation8] sm:$0xff]  ;;  %vm268_vm1 = vcmask 64512   ;;  %v596_v17 = vmov 0.0   ;;  %vm378_vm4 = vcmask 261120  }
  0x4b   :  { %256 = vperm.xlu0 %462, %v251_v1   ;;  %v80_v4 = vld [vmem:[%s740_s0] sm:$0xff]  ;;  %v444_v6 = vpack.c.bf16 %v83_v3, %v82_v2  ;;  %v87_v8 = vld [vmem:[#allocation7 + $0x8] sm:$0xff]  ;;  %v254_v15 = vand.u32 127, %v253_v14  ;;  %v364_v34 = vld [vmem:[#allocation5] sm:$0xff]  ;;  %s598_s2 = smov [#allocation10]  }
  0x4c   :  { %432 = vmatprep.mubr.msk.f32.mxu0 %vm88_vm0, %v80_v4  ;;  %v86_v7 = vld [vmem:[#allocation7] sm:$0xff]  ;;  %v81_v12 = vld [vmem:[%s740_s0 + $0x8] sm:$0xff]  ;;  %s597_s0 = smov 96   ;;  %v365_v38 = vld [vmem:[#allocation5 + $0x8] sm:$0xff]  ;;  %s386_s16 = sshll.u32 %s598_s2, 4  ;;  %s387_s16 = int_to_ptr.vmem [resolvable:$true] %s386_s16 }
  0x4d   :  { %v440_v10 = vpack.c.bf16 %v87_v8, %v86_v7  ;;  %445 = vmatprep.subr.bf16.mxu0 %v444_v6  ;;  %v84_v11 = vld [vmem:[#allocation2] sm:$0xff]  ;;  %v85_v13 = vld [vmem:[#allocation2 + $0x8] sm:$0xff]  ;;  %s559_s1 = scalar_lea.vmem %s387_s16, 256  ;;  %p564_p5 = scmp.lt.s32.totalorder %s387_s16, %s387_s16 }
  0x4e   :  { %447 = vmatpush3.bf16.msra.mxu0 %v444_v6  ;;  %425 = vmatprep.mubr.msk.f32.mxu1 %vm88_vm0, %v84_v11  ;;  %p560_p4 = scmp.ne.s32.totalorder %s387_s16, %s559_s1  ;;  %p565_p6 = scmp.lt.s32.totalorder %s559_s1, %s559_s1 }
  0x4f   :  { %259 = vperm.xlu0 %462, %v252_v5   ;;  %435 = vmatprep.subr.mxu0 %v267_v9 }
  0x50   :  { %441 = vmatprep.subr.bf16.mxu1 %v440_v10  ;;  %p566_p7 = por %p565_p6, %p564_p5 }
  0x51   :  { %443 = vmatpush3.bf16.msra.mxu1 %v440_v10  ;;  %433 = vmatmul.mubr.msk.f32.vlgmr.msra.gmra.mrb[0].mxu0 %vm88_vm0, %v81_v12 }
  0x52   :  { %436 = vmatpush3.msra.mxu0 %v267_v9  ;;  %p567_p8 = pnand %p566_p7, %p560_p4 }
  0x54   :  { %426 = vmatmul.mubr.msk.f32.vlgmr.msra.gmra.mrb[0].mxu1 %vm88_vm0, %v85_v13 }
  0xca   :  { %v257_v16 = vpop.permute.xlu0 %256 }
  0xcb   :  { %vm261_vm2 = vcmp.eq.s32.totalorder %v254_v15, %v257_v16 }
  0xcc   :  { %v404_v18 = vsel %vm261_vm2, 1.0, %v596_v17 }
  0xcd   :  { %437 = vmatprep.mubr.msk.f32.mxu0 %vm268_vm1, %v404_v18 }
  0xce   :  { %v260_v19 = vpop.permute.xlu0 %259 }
  0xcf   :  { %vm262_vm3 = vcmp.eq.s32.totalorder %v254_v15, %v260_v19 }
  0xd0   :  { %v405_v20 = vsel %vm262_vm3, 1.0, %v596_v17 }
  0xd1   :  { %438 = vmatmul.mubr.msk.f32.vlgmr.msra.gmra.mrb[0].mxu0 %vm268_vm1, %v405_v20 }
 0x127   :  { %v427_v21 = vpop.f32.mrb[0].mxu1 }
 0x128   :  { %v161_v22 = vpop.f32.mrb[1].mxu1 }
 0x1a4   :  { %v439_v23 = vpop.f32.mrb[0].mxu0 }
 0x1a5   :  { %v448_v24 = vadd.f32 %v439_v23, %v427_v21  ;;  %v341_v25 = vpop.f32.mrb[1].mxu0 }
 0x1a6   :  { %v449_v26 = vadd.f32 %v341_v25, %v161_v22 }
 0x1a7   :  { %v409_v28 = vmul.f32 -1.442695, %v448_v24 }
 0x1a8   :  { %370 = vrot.lane.b32.xlu1 %v449_v26, %s597_s0  ;;  %v408_v27 = vmul.f32 -1.442695, %v449_v26 }
 0x1aa   :  { %463 = vpow2.f32 %v408_v27 }
 0x1ab   :  { %465 = vpow2.f32 %v409_v28 }
 0x1ac   :  { %372 = vrot.lane.b32.xlu1 %v448_v24, %s597_s0 }
 0x1b4   :  { %v464_v29 = vpop.eup %463 }
 0x1b5   :  { %v358_v30 = vadd.f32 1.0, %v464_v29  ;;  %v466_v31 = vpop.eup %465 }
 0x1b6   :  { %v359_v32 = vadd.f32 1.0, %v466_v31 }
 0x1b7   :  { %467 = vrcp.f32 %v358_v30 }
 0x1b8   :  { %469 = vrcp.f32 %v359_v32 }
 0x1c1   :  { %v468_v33 = vpop.eup %467 }
 0x1c2   :  { %v366_v35 = vmul.f32 %v468_v33, %v364_v34  ;;  %v470_v36 = vpop.eup %469 }
 0x1c3   :  { %v367_v40 = vmul.f32 %v470_v36, %v365_v38 }
 0x21a   :  { %v371_v37 = vpop.permute.xlu1 %370 }
 0x21b   :  { %v376_v39 = vadd.f32 %v371_v37, %v366_v35 }
 0x21d   :  { %379 = vst.msk [vmem:[#allocation10] sm:$0xff] %vm378_vm4, %v376_v39 }
 0x21e   :  { %v373_v41 = vpop.permute.xlu1 %372 }
 0x21f   :  { %v377_v42 = vadd.f32 %v373_v41, %v367_v40 }
 0x221   :  { %380 = vst.msk [vmem:[#allocation10 + $0x8] sm:$0xff] %vm378_vm4, %v377_v42 }
 0x222   :  { %570 = shalt.err (!%p567_p8)
}
 0x223   :  { %s571_s18 = scalar_lea.hbm %s747_s7, 256 }
 0x224   :  { %p572_p9 = scmp.ne.s32.totalorder %s747_s7, %s571_s18  ;;  %p575_p10 = scmp.lt.u32.totalorder %s571_s18, %s747_s7 }
 0x226   :  { %p577_p11 = pnand %p575_p10, %p572_p9 }
 0x228   :  { %580 = shalt.err (!%p577_p11)
}
 0x229   :  { %392 = dma.vmem_to_hbm [thread:$0]  %s387_s16, 256, %s747_s7, [#allocation4], %s591_s13, %s591_s13, %s592_s14  }
 0x22a   :  { %587 = dma.done.wait [#allocation4], 256  }
 0x22b   :  { %588 = vsyncadd [#allocation4], 4294967040 }
 0x22c   :  { %396 = vsyncpa [#allocation3], 1 }
 0x22d   :  { %397 = vsyncpa [#allocation6], 1 }
 0x22e   :  { %398 = vsyncpa [#allocation9], 1 }
 0x22f   :  { %399 = vsyncpa [#allocation4], 1 }

</bundles_post_ra>
